<compile_context>
chip_gen: v6e
topology: v6e:2x2x1
jax: 0.10.0
libtpu: 0.0.40
codegen_flags: <defaults>
</compile_context>

<pallas_src>
import math

import jax
import jax.numpy as jnp
from jax.experimental import pallas as pl
from jax.experimental.pallas import tpu as pltpu


def _row_tile(n_rows: int, row_bytes: int, target_bytes: int = 1 << 20) -> int:
    """Largest power-of-two row tile (>=8) that divides n_rows and fits the budget."""
    for cand in (1024, 512, 256, 128, 64, 32, 16, 8):
        if n_rows % cand == 0 and cand * row_bytes <= target_bytes:
            return cand
    return n_rows  # small / odd row counts: take the whole array as one full block


# ---------------------------------------------------------------------------
# Kernel 1: LayerNormalization over the last axis.
# ---------------------------------------------------------------------------
def _layernorm_kernel(x_ref, alpha_ref, beta_ref, o_ref, *, eps, d):
    x = x_ref[...].astype(jnp.float32)                           # (tN, D)
    mean = jnp.mean(x, axis=-1, keepdims=True)
    xc = x - mean
    var = jnp.sum(xc * xc, axis=-1, keepdims=True) / (d - 1)     # torch.std: unbiased
    std = jnp.sqrt(var)
    y = alpha_ref[...].astype(jnp.float32) * xc / (std + eps) \
        + beta_ref[...].astype(jnp.float32)
    o_ref[...] = y.astype(o_ref.dtype)


def layer_norm(x, alpha, beta, *, eps=1e-6):
    orig_shape = x.shape
    d = orig_shape[-1]
    n = math.prod(orig_shape[:-1])
    x2 = x.reshape(n, d)
    a2 = alpha.reshape(1, d)
    b2 = beta.reshape(1, d)
    tn = _row_tile(n, d * x2.dtype.itemsize)

    out = pl.pallas_call(
        lambda xr, ar, br, orf: _layernorm_kernel(xr, ar, br, orf, eps=eps, d=d),
        out_shape=jax.ShapeDtypeStruct((n, d), x.dtype),
        grid_spec=pl.GridSpec(
            grid=(pl.cdiv(n, tn),),
            in_specs=[
                pl.BlockSpec((tn, d), lambda i: (i, 0)),
                pl.BlockSpec((1, d), lambda i: (0, 0)),   # alpha: stays resident
                pl.BlockSpec((1, d), lambda i: (0, 0)),   # beta:  stays resident
            ],
            out_specs=pl.BlockSpec((tn, d), lambda i: (i, 0)),
        ),
        compiler_params=pltpu.CompilerParams(dimension_semantics=("parallel",)),
    )(x2, a2, b2)
    return out.reshape(orig_shape)


# ---------------------------------------------------------------------------
# Kernel 2: residual add with fused dropout.
# ---------------------------------------------------------------------------
def _residual_dropout_kernel(x_ref, sub_ref, rand_ref, o_ref, *, p):
    x = x_ref[...].astype(jnp.float32)
    s = sub_ref[...].astype(jnp.float32)
    keep = rand_ref[...] >= p                                   # P(keep) = 1 - p
    s = jnp.where(keep, s * (1.0 / (1.0 - p)), 0.0)
    o_ref[...] = (x + s).astype(o_ref.dtype)


def _residual_add_kernel(x_ref, sub_ref, o_ref):
    o_ref[...] = (x_ref[...].astype(jnp.float32)
                  + sub_ref[...].astype(jnp.float32)).astype(o_ref.dtype)


def residual_dropout_add(x, sub, *, dropout_p, key=None, training=True):
    orig_shape = x.shape
    total = math.prod(orig_shape)
    # Lane-dense layout for the purely elementwise pass (avoids masked stores
    # when the model dim is < 128, e.g. D=32 in the example).
    d = 128 if total % 128 == 0 else orig_shape[-1]
    n = total // d
    x2 = x.reshape(n, d)
    s2 = sub.reshape(n, d)
    tn = _row_tile(n, d * x2.dtype.itemsize)
    grid = (pl.cdiv(n, tn),)
    row_spec = pl.BlockSpec((tn, d), lambda i: (i, 0))
    cparams = pltpu.CompilerParams(dimension_semantics=("parallel",))

    if training and dropout_p > 0.0:
        rand = jax.random.uniform(key, (n, d), dtype=jnp.float32)
        out = pl.pallas_call(
            lambda xr, sr, rr, orf: _residual_dropout_kernel(xr, sr, rr, orf,
                                                             p=dropout_p),
            out_shape=jax.ShapeDtypeStruct((n, d), x.dtype),
            grid_spec=pl.GridSpec(grid=grid, in_specs=[row_spec] * 3,
                                  out_specs=row_spec),
            compiler_params=cparams,
        )(x2, s2, rand)
    else:
        out = pl.pallas_call(
            _residual_add_kernel,
            out_shape=jax.ShapeDtypeStruct((n, d), x.dtype),
            grid_spec=pl.GridSpec(grid=grid, in_specs=[row_spec] * 2,
                                  out_specs=row_spec),
            compiler_params=cparams,
        )(x2, s2)
    return out.reshape(orig_shape)


# ---------------------------------------------------------------------------
# ResidualConnection.forward equivalent.
# ---------------------------------------------------------------------------
def residual_connection(x, sublayer, *, dropout_p, alpha, beta, key=None,
                        training=True, eps=1e-6):
    """x + dropout(sublayer(LayerNorm(x))) — matches the PyTorch module forward."""
    normed = layer_norm(x, alpha, beta, eps=eps)
    sub_out = sublayer(normed)                     # arbitrary callable, plain JAX
    return residual_dropout_add(x, sub_out, dropout_p=dropout_p, key=key,
                                training=training)


if __name__ == "__main__":
    B, T, D = 2, 8, 32
    dropout_p = 0.1

    root = jax.random.PRNGKey(0)
    kx, kw, kd = jax.random.split(root, 3)
    x = jax.random.normal(kx, (B, T, D), dtype=jnp.float32)

    # Example sublayer: deterministic linear projection (plain JAX).
    W = jax.random.normal(kw, (D, D), dtype=jnp.float32) / math.sqrt(D)
    sublayer = lambda y: y @ W

    # LayerNormalization parameters at their PyTorch init values.
    alpha = jnp.ones((D,), dtype=jnp.float32)
    beta = jnp.zeros((D,), dtype=jnp.float32)

    # Eval mode (nn.Dropout is identity): check against a pure-JAX reference.
    out_eval = residual_connection(x, sublayer, dropout_p=dropout_p,
                                   alpha=alpha, beta=beta, training=False)
    out_eval = jax.block_until_ready(out_eval)

    mean = x.mean(axis=-1, keepdims=True)
    std = jnp.sqrt(((x - mean) ** 2).sum(axis=-1, keepdims=True) / (D - 1))
    normed_ref = alpha * (x - mean) / (std + 1e-6) + beta
    ref = x + sublayer(normed_ref)
    assert jnp.allclose(out_eval, ref, atol=1e-5, rtol=1e-5), "eval-mode mismatch"

    # Training mode: dropout mask from jax.random, applied inside the kernel.
    out_train = residual_connection(x, sublayer, dropout_p=dropout_p,
                                    alpha=alpha, beta=beta, key=kd, training=True)
    out_train = jax.block_until_ready(out_train)
    assert out_train.shape == (B, T, D)
    assert bool(jnp.all(jnp.isfinite(out_train)))

    print("KERNEL_OK")
</pallas_src>

<mosaic_0001>
module attributes {stable_mosaic.version = 11 : i64} {
  func.func @_lambda_(%arg0: i32, %arg1: memref<16x32xf32, #tpu.memory_space<vmem>>, %arg2: memref<1x32xf32, #tpu.memory_space<vmem>>, %arg3: memref<1x32xf32, #tpu.memory_space<vmem>>, %arg4: memref<16x32xf32, #tpu.memory_space<vmem>>) attributes {dimension_semantics = [#tpu.dimension_semantics<parallel>], iteration_bounds = array<i64: 1>, scalar_prefetch = 0 : i64, scratch_operands = 0 : i64, tpu.core_type = #tpu.core_type<tc>, window_params = [{transform_indices = @transform_0, window_bounds = array<i64: 16, 32>}, {pipeline_mode = #tpu.pipeline_mode<synchronous>, transform_indices = @transform_1, window_bounds = array<i64: 1, 32>}, {pipeline_mode = #tpu.pipeline_mode<synchronous>, transform_indices = @transform_2, window_bounds = array<i64: 1, 32>}, {transform_indices = @transform_3, window_bounds = array<i64: 16, 32>}]} {
    %c0 = arith.constant 0 : index
    %c0_0 = arith.constant 0 : index
    %0 = vector.load %arg1[%c0, %c0_0] : memref<16x32xf32, #tpu.memory_space<vmem>>, vector<16x32xf32>
    %cst = arith.constant dense<0.000000e+00> : vector<16xf32>
    %1 = vector.multi_reduction <add>, %0, %cst [1] : vector<16x32xf32> to vector<16xf32>
    %2 = vector.shape_cast %1 : vector<16xf32> to vector<16x1xf32>
    %cst_1 = arith.constant 3.200000e+01 : f32
    %3 = vector.broadcast %cst_1 : f32 to vector<16x1xf32>
    %4 = arith.divf %2, %3 : vector<16x1xf32>
    %5 = vector.broadcast %4 : vector<16x1xf32> to vector<16x32xf32>
    %6 = arith.subf %0, %5 : vector<16x32xf32>
    %7 = arith.mulf %6, %6 : vector<16x32xf32>
    %cst_2 = arith.constant dense<0.000000e+00> : vector<16xf32>
    %8 = vector.multi_reduction <add>, %7, %cst_2 [1] : vector<16x32xf32> to vector<16xf32>
    %9 = vector.shape_cast %8 : vector<16xf32> to vector<16x1xf32>
    %cst_3 = arith.constant 3.100000e+01 : f32
    %10 = vector.broadcast %cst_3 : f32 to vector<16x1xf32>
    %11 = arith.divf %9, %10 : vector<16x1xf32>
    %12 = math.sqrt %11 : vector<16x1xf32>
    %c0_4 = arith.constant 0 : index
    %c0_5 = arith.constant 0 : index
    %13 = vector.load %arg2[%c0_4, %c0_5] : memref<1x32xf32, #tpu.memory_space<vmem>>, vector<1x32xf32>
    %14 = vector.broadcast %13 : vector<1x32xf32> to vector<16x32xf32>
    %15 = arith.mulf %14, %6 : vector<16x32xf32>
    %cst_6 = arith.constant 9.99999997E-7 : f32
    %16 = vector.broadcast %cst_6 : f32 to vector<16x1xf32>
    %17 = arith.addf %12, %16 : vector<16x1xf32>
    %18 = vector.broadcast %17 : vector<16x1xf32> to vector<16x32xf32>
    %19 = arith.divf %15, %18 : vector<16x32xf32>
    %c0_7 = arith.constant 0 : index
    %c0_8 = arith.constant 0 : index
    %20 = vector.load %arg3[%c0_7, %c0_8] : memref<1x32xf32, #tpu.memory_space<vmem>>, vector<1x32xf32>
    %21 = vector.broadcast %20 : vector<1x32xf32> to vector<16x32xf32>
    %22 = arith.addf %19, %21 : vector<16x32xf32>
    %c0_9 = arith.constant 0 : index
    %c0_10 = arith.constant 0 : index
    %23 = vector.load %arg4[%c0_9, %c0_10] : memref<16x32xf32, #tpu.memory_space<vmem>>, vector<16x32xf32>
    tpu.vector_store %arg4[%c0_9, %c0_10], %22 {strides = array<i32>} : memref<16x32xf32, #tpu.memory_space<vmem>>, vector<16x32xf32>,
    return
  }
  func.func @transform_0(%arg0: i32) -> (i32, i32) {
    %c0_i32 = arith.constant 0 : i32
    %c0_i32_0 = arith.constant 0 : i32
    return %arg0, %c0_i32 : i32, i32
  }
  func.func @transform_1(%arg0: i32) -> (i32, i32) {
    %c0_i32 = arith.constant 0 : i32
    %c0_i32_0 = arith.constant 0 : i32
    %c0_i32_1 = arith.constant 0 : i32
    return %c0_i32, %c0_i32_0 : i32, i32
  }
  func.func @transform_2(%arg0: i32) -> (i32, i32) {
    %c0_i32 = arith.constant 0 : i32
    %c0_i32_0 = arith.constant 0 : i32
    %c0_i32_1 = arith.constant 0 : i32
    return %c0_i32, %c0_i32_0 : i32, i32
  }
  func.func @transform_3(%arg0: i32) -> (i32, i32) {
    %c0_i32 = arith.constant 0 : i32
    %c0_i32_0 = arith.constant 0 : i32
    return %arg0, %c0_i32 : i32, i32
  }
}

</mosaic_0001>

<bundles_post_ra>
// kernel: tpu_custom_call.1
= control target key start
LH: loop header
LB: loop body
LE: loop exit
PB: predicated region body
PF: predicated region fallthrough
CT: control target
= control target key end

     0   :  { %8 = vsyncpa [#allocation3], 0  ;;  %s217_s0 = inlined_call_operand.hbm [shape: f32[16,32], index: 0, kind: input, shape index: {}]   ;;  %s218_s1 = inlined_call_operand.vmem [shape: f32[1,32], index: 1, kind: input, shape index: {}]   ;;  %s219_s2 = inlined_call_operand.vmem [shape: f32[1,32], index: 2, kind: input, shape index: {}]   ;;  %s220_s3 = inlined_call_operand.hbm [shape: f32[16,32], index: 3, kind: output, shape index: {}]  }
   0x1   :  { %9 = vsyncpa [#allocation4], 0  ;;  %s169_s12 = smov [#allocation2]  }
   0x2   :  { %s15_s13 = sshll.u32 %s169_s12, 4  ;;  %s16_s13 = int_to_ptr.vmem [resolvable:$true] %s15_s13 }
   0x3   :  { %s133_s14 = scalar_lea.vmem %s16_s13, 256  ;;  %p138_p1 = scmp.lt.s32.totalorder %s16_s13, %s16_s13 }
   0x4   :  { %p134_p0 = scmp.ne.s32.totalorder %s16_s13, %s133_s14  ;;  %p139_p2 = scmp.lt.s32.totalorder %s133_s14, %s133_s14 }
   0x6   :  { %p140_p3 = por %p139_p2, %p138_p1 }
   0x8   :  { %p141_p4 = pnand %p140_p3, %p134_p0 }
   0xa   :  { %144 = shalt.err (!%p141_p4)
}
   0xb   :  { %s170_s15 = smov 128   ;;  %s171_s16 = smov 8  }
   0xc   :  { %21 = dma.hbm_to_vmem [thread:$0]  %s217_s0, 256, %s16_s13, [#allocation3], %s170_s15, %s170_s15, %s171_s16  }
   0xd   :  { %165 = dma.done.wait [#allocation3], 256  }
   0xe   :  { %166 = vsyncadd [#allocation3], 4294967040  ;;  %vm31_vm0 = vcmask 261120   ;;  %v29_v0 = vld [vmem:[#allocation2] sm:$0xff]  ;;  %v30_v1 = vld [vmem:[#allocation2 + $0x8] sm:$0xff]  ;;  %s172_s22 = smov [#allocation5]  }
   0xf   :  { %v32_v2 = vsel %vm31_vm0, %v29_v0, 0.0  ;;  %v35_v3 = vsel %vm31_vm0, %v30_v1, 0.0  ;;  %v111_v30 = vld [vmem:[%s218_s1] ss:$0 sm:$0xff]  ;;  %s99_s23 = sshll.u32 %s172_s22, 4  ;;  %s100_s23 = int_to_ptr.vmem [resolvable:$true] %s99_s23 }
  0x10   :  { %33 = vadd.xlane.f32.xlu0 %v32_v2  ;;  %v112_v33 = vld [vmem:[%s219_s2] ss:$0 sm:$0xff]  ;;  %s145_s1 = scalar_lea.vmem %s100_s23, 256  ;;  %p150_p6 = scmp.lt.s32.totalorder %s100_s23, %s100_s23 }
  0x11   :  { %p146_p5 = scmp.ne.s32.totalorder %s100_s23, %s145_s1  ;;  %p151_p7 = scmp.lt.s32.totalorder %s145_s1, %s145_s1 }
  0x13   :  { %p152_p8 = por %p151_p7, %p150_p6 }
  0x14   :  { %36 = vadd.xlane.f32.xlu0 %v35_v3 }
  0x15   :  { %p153_p9 = pnand %p152_p8, %p146_p5 }
  0x99   :  { %v34_v4 = vpop.xlane.xlu0 %33 }
  0x9a   :  { %v39_v5 = vmul.f32 0.03125, %v34_v4 }
  0x9c   :  { %v41_v6 = vsub.f32 %v29_v0, %v39_v5 }
  0x9d   :  { %v37_v7 = vpop.xlane.xlu0 %36 }
  0x9e   :  { %v40_v8 = vmul.f32 0.03125, %v37_v7  ;;  %v43_v9 = vmul.f32 %v41_v6, %v41_v6  ;;  %v75_v31 = vmul.f32 %v111_v30, %v41_v6 }
  0xa0   :  { %v42_v10 = vsub.f32 %v30_v1, %v40_v8  ;;  %v45_v11 = vsel %vm31_vm0, %v43_v9, 0.0 }
  0xa1   :  { %46 = vadd.xlane.f32.xlu1 %v45_v11 }
  0xa2   :  { %v44_v12 = vmul.f32 %v42_v10, %v42_v10  ;;  %v76_v35 = vmul.f32 %v111_v30, %v42_v10 }
  0xa4   :  { %v48_v13 = vsel %vm31_vm0, %v44_v12, 0.0 }
  0xa5   :  { %49 = vadd.xlane.f32.xlu1 %v48_v13 }
 0x12a   :  { %v47_v14 = vpop.xlane.xlu1 %46 }
 0x12b   :  { %v52_v15 = vmul.f32 0.032258064, %v47_v14 }
 0x12d   :  { %117 = vrsqrt.f32 %v52_v15  ;;  %vm56_vm1 = vcmp.eq.f32.partialorder %v52_v15, inf  ;;  %v59_v20 = vand.u32 2147483648, %v52_v15  ;;  %vm58_vm2 = vcmp.eq.f32.partialorder %v52_v15, 0.0 }
 0x12e   :  { %v50_v16 = vpop.xlane.xlu1 %49 }
 0x12f   :  { %v53_v17 = vmul.f32 0.032258064, %v50_v16 }
 0x131   :  { %119 = vrsqrt.f32 %v53_v17  ;;  %vm63_vm3 = vcmp.eq.f32.partialorder %v53_v17, inf  ;;  %v66_v26 = vand.u32 2147483648, %v53_v17  ;;  %vm65_vm4 = vcmp.eq.f32.partialorder %v53_v17, 0.0 }
 0x13a   :  { %v118_v18 = vpop.eup %117 }
 0x13b   :  { %v55_v19 = vmul.f32 %v118_v18, %v52_v15 }
 0x13d   :  { %v57_v21 = vsel %vm56_vm1, %v52_v15, %v55_v19 }
 0x13e   :  { %v120_v22 = vpop.eup %119  ;;  %v60_v23 = vsel %vm58_vm2, %v59_v20, %v57_v21 }
 0x13f   :  { %v77_v24 = vadd.f32 1e-06, %v60_v23  ;;  %v62_v25 = vmul.f32 %v120_v22, %v53_v17 }
 0x141   :  { %121 = vrcp.f32 %v77_v24  ;;  %v64_v27 = vsel %vm63_vm3, %v53_v17, %v62_v25 }
 0x142   :  { %v67_v28 = vsel %vm65_vm4, %v66_v26, %v64_v27 }
 0x143   :  { %v78_v29 = vadd.f32 1e-06, %v67_v28 }
 0x145   :  { %123 = vrcp.f32 %v78_v29 }
 0x14e   :  { %v122_v32 = vpop.eup %121 }
 0x14f   :  { %v80_v34 = vmul.f32 %v122_v32, %v75_v31 }
 0x151   :  { %v90_v36 = vadd.f32 %v112_v33, %v80_v34 }
 0x152   :  { %v124_v37 = vpop.eup %123 }
 0x153   :  { %v82_v38 = vmul.f32 %v124_v37, %v76_v35  ;;  %92 = vst.msk [vmem:[#allocation5] sm:$0xff] %vm31_vm0, %v90_v36 }
 0x155   :  { %v91_v39 = vadd.f32 %v112_v33, %v82_v38 }
 0x157   :  { %93 = vst.msk [vmem:[#allocation5 + $0x8] sm:$0xff] %vm31_vm0, %v91_v39 }
 0x158   :  { %156 = shalt.err (!%p153_p9)
}
 0x159   :  { %105 = dma.vmem_to_hbm [thread:$0]  %s100_s23, 256, %s220_s3, [#allocation4], %s170_s15, %s170_s15, %s171_s16  }
 0x15a   :  { %167 = dma.done.wait [#allocation4], 256  }
 0x15b   :  { %168 = vsyncadd [#allocation4], 4294967040 }
 0x15c   :  { %109 = vsyncpa [#allocation3], 1 }
 0x15d   :  { %110 = vsyncpa [#allocation4], 1 }

</bundles_post_ra>
